<compile_context>
chip_gen: v7x
topology: tpu7x:2x2x1
jax: 0.10.0
libtpu: 0.0.40
codegen_flags: <defaults>
</compile_context>

<pallas_src>
import math
import jax
import jax.numpy as jnp
from jax.experimental import pallas as pl
from jax.experimental.pallas import tpu as pltpu

LANE = 128
SUBLANE = 8


def _cdiv(a, b):
    return -(-a // b)


def _round_up(x, m):
    return _cdiv(x, m) * m


def _pad_to(x, shape):
    pads = [(0, t - s) for s, t in zip(x.shape, shape)]
    return jnp.pad(x, pads)


# ----------------------------------------------------------------------------
# Kernel
# ----------------------------------------------------------------------------
def critic_kernel(x_ref,
                  w1_ref, b1_ref,
                  w2_ref, b2_ref,
                  w3_ref, b3_ref,
                  w4_ref, b4_ref,
                  o_ref):
    """One batch tile (feature-major) of the fused 4-layer MLP.

    Per grid step:
      x_ref : (S+A, bm) f32   batch on the lane axis
      w1_ref: (Hp, S+A) bf16  resident, transposed, hidden zero-padded
      w2_ref: (Hp, Hp)  bf16
      w3_ref: (Hp, Hp)  bf16
      w4_ref: (8,  Hp)  bf16  row 0 is the real output row
      b*_ref: (Hp, 1)   f32   per-sublane biases
      b4_ref: (1, 1)    f32   scalar, in SMEM
      o_ref : (8, bm)   f32   row 0 is the real Q value (lane-dense store)
    """
    f32 = jnp.float32
    bf16 = jnp.bfloat16

    # Layer 1 (single stacked matmul over [state; action]).
    x = x_ref[...].astype(bf16)
    h = jnp.dot(w1_ref[...], x, preferred_element_type=f32) + b1_ref[...]
    h = jnp.maximum(h, 0.0)

    # Layer 2.
    h = jnp.dot(w2_ref[...], h.astype(bf16), preferred_element_type=f32) + b2_ref[...]
    h = jnp.maximum(h, 0.0)

    # Layer 3.
    h = jnp.dot(w3_ref[...], h.astype(bf16), preferred_element_type=f32) + b3_ref[...]
    h = jnp.maximum(h, 0.0)

    # Layer 4: (8, Hp) x (Hp, bm) -> (8, bm); only sublane 0 is real.
    q = jnp.dot(w4_ref[...], h.astype(bf16), preferred_element_type=f32) + b4_ref[0, 0]
    o_ref[...] = q.astype(o_ref.dtype)


# ----------------------------------------------------------------------------
# Parameter / layout preparation (one-time)
# ----------------------------------------------------------------------------
def prepare_params_for_kernel(params, compute_dtype=jnp.bfloat16):
    """Transpose to feature-major, zero-pad hidden to a multiple of 128 lanes,
    pad the final layer to 8 sublanes, and cast matmul operands to bf16.
    Padding is exact: ReLU(0)=0 and zero weight rows/cols contribute nothing."""
    (w1, b1), (w2, b2), (w3, b3), (w4, b4) = params
    in_dim, hidden = w1.shape
    hp = _round_up(hidden, LANE)

    w1t = _pad_to(w1.T, (hp, in_dim)).astype(compute_dtype)        # (Hp, S+A)
    b1t = _pad_to(b1.reshape(-1, 1), (hp, 1)).astype(jnp.float32)  # (Hp, 1)
    w2t = _pad_to(w2.T, (hp, hp)).astype(compute_dtype)            # (Hp, Hp)
    b2t = _pad_to(b2.reshape(-1, 1), (hp, 1)).astype(jnp.float32)
    w3t = _pad_to(w3.T, (hp, hp)).astype(compute_dtype)
    b3t = _pad_to(b3.reshape(-1, 1), (hp, 1)).astype(jnp.float32)
    w4t = _pad_to(w4.T, (SUBLANE, hp)).astype(compute_dtype)       # (8, Hp), row 0 real
    b4s = jnp.asarray(b4, jnp.float32).reshape(1, 1)               # scalar -> SMEM
    return (w1t, b1t, w2t, b2t, w3t, b3t, w4t, b4s)


def _choose_batch_tiling(batch, block_m, min_tiles):
    """Balanced, lane-aligned batch tiling.

    Keeps at least `min_tiles` grid steps (v7x megacore) when the batch allows,
    and avoids a near-empty trailing tile (e.g. B=1100, block_m=1024 -> two
    balanced 640-wide tiles instead of 1024 + 128-of-which-mostly-padding)."""
    bp0 = _round_up(max(batch, 1), LANE)
    max_tiles = bp0 // LANE
    block_m = max(_round_up(block_m, LANE), LANE)
    n_tiles = max(_cdiv(bp0, block_m), min_tiles)
    n_tiles = max(1, min(n_tiles, max_tiles))
    bm = _round_up(_cdiv(bp0, n_tiles), LANE)
    n_tiles = _cdiv(bp0, bm)
    bp = n_tiles * bm
    return bp, bm, n_tiles


# ----------------------------------------------------------------------------
# Wrapper
# ----------------------------------------------------------------------------
def critic_forward(state, action, kparams, *, block_m=1024, min_tiles=2):
    """Fused critic MLP. Returns (B, 1) f32 Q-values."""
    w1t, b1t, w2t, b2t, w3t, b3t, w4t, b4s = kparams
    B = state.shape[0]
    SA = w1t.shape[1]
    Hp = w1t.shape[0]

    Bp, bm, n_tiles = _choose_batch_tiling(B, block_m, min_tiles)

    # Feature-major input: one host-side concat + transpose + pad layout pass;
    # the kernel then reads (and writes) fully lane-dense slabs.
    x = jnp.concatenate([state, action], axis=-1).astype(jnp.float32)  # (B, S+A)
    xt = _pad_to(x.T, (SA, Bp))                                        # (S+A, Bp)

    in_specs = [
        pl.BlockSpec((SA, bm), lambda i: (0, i)),        # x^T batch tile
        pl.BlockSpec((Hp, SA), lambda i: (0, 0)),        # W1^T (resident)
        pl.BlockSpec((Hp, 1), lambda i: (0, 0)),         # b1
        pl.BlockSpec((Hp, Hp), lambda i: (0, 0)),        # W2^T
        pl.BlockSpec((Hp, 1), lambda i: (0, 0)),         # b2
        pl.BlockSpec((Hp, Hp), lambda i: (0, 0)),        # W3^T
        pl.BlockSpec((Hp, 1), lambda i: (0, 0)),         # b3
        pl.BlockSpec((SUBLANE, Hp), lambda i: (0, 0)),   # W4^T (8 sublanes)
        pl.BlockSpec(memory_space=pltpu.MemorySpace.SMEM),  # b4 scalar
    ]

    out = pl.pallas_call(
        critic_kernel,
        grid=(n_tiles,),
        in_specs=in_specs,
        out_specs=pl.BlockSpec((SUBLANE, bm), lambda i: (0, i)),
        out_shape=jax.ShapeDtypeStruct((SUBLANE, Bp), jnp.float32),
        compiler_params=pltpu.CompilerParams(
            dimension_semantics=("parallel",),
            vmem_limit_bytes=32 * 1024 * 1024,
        ),
    )(xt, w1t, b1t, w2t, b2t, w3t, b3t, w4t, b4s)

    # Free layout plumbing: real Q lives in sublane 0, real batch in lanes [:B].
    return out[0, :B].reshape(B, 1)


# ----------------------------------------------------------------------------
# Params / reference
# ----------------------------------------------------------------------------
def init_linear(key, fan_in, fan_out):
    """Deterministic init mimicking torch.nn.Linear default (uniform +/- 1/sqrt(fan_in)).
    Weight is returned already transposed to [fan_in, fan_out]."""
    kw, kb = jax.random.split(key)
    bound = 1.0 / math.sqrt(fan_in)
    w = jax.random.uniform(kw, (fan_in, fan_out), jnp.float32, -bound, bound)
    b = jax.random.uniform(kb, (1, fan_out), jnp.float32, -bound, bound)
    return w, b


def make_critic_params(key, state_dim, action_dim, hidden_dim):
    k1, k2, k3, k4 = jax.random.split(key, 4)
    in_dim = state_dim + action_dim
    return (
        init_linear(k1, in_dim, hidden_dim),
        init_linear(k2, hidden_dim, hidden_dim),
        init_linear(k3, hidden_dim, hidden_dim),
        init_linear(k4, hidden_dim, 1),
    )


def critic_reference(state, action, params):
    """Pure-JAX reference (direct translation of the PyTorch module, f32)."""
    x = jnp.concatenate([state, action], axis=-1)
    (w1, b1), (w2, b2), (w3, b3), (w4, b4) = params
    h = jnp.maximum(x @ w1 + b1, 0.0)
    h = jnp.maximum(h @ w2 + b2, 0.0)
    h = jnp.maximum(h @ w3 + b3, 0.0)
    return h @ w4 + b4


if __name__ == "__main__":
    key = jax.random.PRNGKey(0)
    k_params, k_state, k_action, k_state2, k_action2 = jax.random.split(key, 5)

    batch = 8
    state_dim = 12
    action_dim = 4
    hidden_dim = 32

    params = make_critic_params(k_params, state_dim, action_dim, hidden_dim)
    kparams = prepare_params_for_kernel(params)   # bf16 matmul operands

    # Small shapes consistent with the module spec.
    state = jax.random.normal(k_state, (batch, state_dim), jnp.float32)
    action = jax.random.normal(k_action, (batch, action_dim), jnp.float32)

    q = jax.block_until_ready(critic_forward(state, action, kparams))
    q_ref = critic_reference(state, action, params)
    assert q.shape == (batch, 1)
    # bf16 matmul operands with f32 accumulation -> loosened tolerance vs f32 ref.
    assert jnp.allclose(q, q_ref, atol=5e-2, rtol=5e-2)

    # Exercise the multi-tile (multi-grid-step, padded-batch) path as well.
    big_batch = 300
    state2 = jax.random.normal(k_state2, (big_batch, state_dim), jnp.float32)
    action2 = jax.random.normal(k_action2, (big_batch, action_dim), jnp.float32)
    q2 = jax.block_until_ready(
        critic_forward(state2, action2, kparams, block_m=128, min_tiles=2))
    q2_ref = critic_reference(state2, action2, params)
    assert q2.shape == (big_batch, 1)
    assert jnp.allclose(q2, q2_ref, atol=5e-2, rtol=5e-2)

    print("KERNEL_OK")
</pallas_src>

<mosaic_0001>
module attributes {stable_mosaic.version = 11 : i64} {
  func.func @critic_kernel(%arg0: i32, %arg1: memref<16x128xf32, #tpu.memory_space<vmem>>, %arg2: memref<128x16xbf16, #tpu.memory_space<vmem>>, %arg3: memref<128x1xf32, #tpu.memory_space<vmem>>, %arg4: memref<128x128xbf16, #tpu.memory_space<vmem>>, %arg5: memref<128x1xf32, #tpu.memory_space<vmem>>, %arg6: memref<128x128xbf16, #tpu.memory_space<vmem>>, %arg7: memref<128x1xf32, #tpu.memory_space<vmem>>, %arg8: memref<8x128xbf16, #tpu.memory_space<vmem>>, %arg9: memref<1x1xf32, #tpu.memory_space<smem>>, %arg10: memref<8x128xf32, #tpu.memory_space<vmem>>) attributes {dimension_semantics = [#tpu.dimension_semantics<parallel>], iteration_bounds = array<i64: 1>, scalar_prefetch = 0 : i64, scratch_operands = 0 : i64, tpu.core_type = #tpu.core_type<tc>, window_params = [{transform_indices = @transform_0, window_bounds = array<i64: 16, 128>}, {pipeline_mode = #tpu.pipeline_mode<synchronous>, transform_indices = @transform_1, window_bounds = array<i64: 128, 16>}, {pipeline_mode = #tpu.pipeline_mode<synchronous>, transform_indices = @transform_2, window_bounds = array<i64: 128, 1>}, {pipeline_mode = #tpu.pipeline_mode<synchronous>, transform_indices = @transform_3, window_bounds = array<i64: 128, 128>}, {pipeline_mode = #tpu.pipeline_mode<synchronous>, transform_indices = @transform_4, window_bounds = array<i64: 128, 1>}, {pipeline_mode = #tpu.pipeline_mode<synchronous>, transform_indices = @transform_5, window_bounds = array<i64: 128, 128>}, {pipeline_mode = #tpu.pipeline_mode<synchronous>, transform_indices = @transform_6, window_bounds = array<i64: 128, 1>}, {pipeline_mode = #tpu.pipeline_mode<synchronous>, transform_indices = @transform_7, window_bounds = array<i64: 8, 128>}, {transform_indices = @transform_8, window_bounds = array<i64: 1, 1>}, {transform_indices = @transform_9, window_bounds = array<i64: 8, 128>}]} {
    %c0 = arith.constant 0 : index
    %c0_0 = arith.constant 0 : index
    %0 = vector.load %arg1[%c0, %c0_0] : memref<16x128xf32, #tpu.memory_space<vmem>>, vector<16x128xf32>
    %1 = arith.truncf %0 : vector<16x128xf32> to vector<16x128xbf16>
    %c0_1 = arith.constant 0 : index
    %c0_2 = arith.constant 0 : index
    %2 = vector.load %arg2[%c0_1, %c0_2] : memref<128x16xbf16, #tpu.memory_space<vmem>>, vector<128x16xbf16>
    %cst = arith.constant dense<0.000000e+00> : vector<128x128xf32>
    %3 = tpu.matmul %2, %1, %cst {dimension_numbers = #tpu.dot_dimension_numbers<[1], [0], [0], [1], [0, 0, 1, 1], [], []>} : vector<128x16xbf16>, vector<16x128xbf16>, vector<128x128xf32> -> vector<128x128xf32>
    %c0_3 = arith.constant 0 : index
    %c0_4 = arith.constant 0 : index
    %4 = vector.load %arg3[%c0_3, %c0_4] : memref<128x1xf32, #tpu.memory_space<vmem>>, vector<128x1xf32>
    %5 = vector.broadcast %4 : vector<128x1xf32> to vector<128x128xf32>
    %6 = arith.addf %3, %5 : vector<128x128xf32>
    %cst_5 = arith.constant 0.000000e+00 : f32
    %7 = vector.broadcast %cst_5 : f32 to vector<128x128xf32>
    %8 = arith.maximumf %6, %7 : vector<128x128xf32>
    %c0_6 = arith.constant 0 : index
    %c0_7 = arith.constant 0 : index
    %9 = vector.load %arg4[%c0_6, %c0_7] : memref<128x128xbf16, #tpu.memory_space<vmem>>, vector<128x128xbf16>
    %10 = arith.truncf %8 : vector<128x128xf32> to vector<128x128xbf16>
    %cst_8 = arith.constant dense<0.000000e+00> : vector<128x128xf32>
    %11 = tpu.matmul %9, %10, %cst_8 {dimension_numbers = #tpu.dot_dimension_numbers<[1], [0], [0], [1], [0, 0, 1, 1], [], []>} : vector<128x128xbf16>, vector<128x128xbf16>, vector<128x128xf32> -> vector<128x128xf32>
    %c0_9 = arith.constant 0 : index
    %c0_10 = arith.constant 0 : index
    %12 = vector.load %arg5[%c0_9, %c0_10] : memref<128x1xf32, #tpu.memory_space<vmem>>, vector<128x1xf32>
    %13 = vector.broadcast %12 : vector<128x1xf32> to vector<128x128xf32>
    %14 = arith.addf %11, %13 : vector<128x128xf32>
    %cst_11 = arith.constant 0.000000e+00 : f32
    %15 = vector.broadcast %cst_11 : f32 to vector<128x128xf32>
    %16 = arith.maximumf %14, %15 : vector<128x128xf32>
    %c0_12 = arith.constant 0 : index
    %c0_13 = arith.constant 0 : index
    %17 = vector.load %arg6[%c0_12, %c0_13] : memref<128x128xbf16, #tpu.memory_space<vmem>>, vector<128x128xbf16>
    %18 = arith.truncf %16 : vector<128x128xf32> to vector<128x128xbf16>
    %cst_14 = arith.constant dense<0.000000e+00> : vector<128x128xf32>
    %19 = tpu.matmul %17, %18, %cst_14 {dimension_numbers = #tpu.dot_dimension_numbers<[1], [0], [0], [1], [0, 0, 1, 1], [], []>} : vector<128x128xbf16>, vector<128x128xbf16>, vector<128x128xf32> -> vector<128x128xf32>
    %c0_15 = arith.constant 0 : index
    %c0_16 = arith.constant 0 : index
    %20 = vector.load %arg7[%c0_15, %c0_16] : memref<128x1xf32, #tpu.memory_space<vmem>>, vector<128x1xf32>
    %21 = vector.broadcast %20 : vector<128x1xf32> to vector<128x128xf32>
    %22 = arith.addf %19, %21 : vector<128x128xf32>
    %cst_17 = arith.constant 0.000000e+00 : f32
    %23 = vector.broadcast %cst_17 : f32 to vector<128x128xf32>
    %24 = arith.maximumf %22, %23 : vector<128x128xf32>
    %c0_18 = arith.constant 0 : index
    %c0_19 = arith.constant 0 : index
    %25 = vector.load %arg8[%c0_18, %c0_19] : memref<8x128xbf16, #tpu.memory_space<vmem>>, vector<8x128xbf16>
    %26 = arith.truncf %24 : vector<128x128xf32> to vector<128x128xbf16>
    %cst_20 = arith.constant dense<0.000000e+00> : vector<8x128xf32>
    %27 = tpu.matmul %25, %26, %cst_20 {dimension_numbers = #tpu.dot_dimension_numbers<[1], [0], [0], [1], [0, 0, 1, 1], [], []>} : vector<8x128xbf16>, vector<128x128xbf16>, vector<8x128xf32> -> vector<8x128xf32>
    %c0_21 = arith.constant 0 : index
    %c0_22 = arith.constant 0 : index
    %28 = memref.load %arg9[%c0_21, %c0_22] : memref<1x1xf32, #tpu.memory_space<smem>>
    %29 = vector.broadcast %28 : f32 to vector<8x128xf32>
    %30 = arith.addf %27, %29 : vector<8x128xf32>
    %c0_23 = arith.constant 0 : index
    %c0_24 = arith.constant 0 : index
    %31 = vector.load %arg10[%c0_23, %c0_24] : memref<8x128xf32, #tpu.memory_space<vmem>>, vector<8x128xf32>
    tpu.vector_store %arg10[%c0_23, %c0_24], %30 {strides = array<i32>} : memref<8x128xf32, #tpu.memory_space<vmem>>, vector<8x128xf32>,
    return
  }
  func.func @transform_0(%arg0: i32) -> (i32, i32) {
    %c0_i32 = arith.constant 0 : i32
    %c0_i32_0 = arith.constant 0 : i32
    return %c0_i32, %arg0 : i32, i32
  }
  func.func @transform_1(%arg0: i32) -> (i32, i32) {
    %c0_i32 = arith.constant 0 : i32
    %c0_i32_0 = arith.constant 0 : i32
    %c0_i32_1 = arith.constant 0 : i32
    return %c0_i32, %c0_i32_0 : i32, i32
  }
  func.func @transform_2(%arg0: i32) -> (i32, i32) {
    %c0_i32 = arith.constant 0 : i32
    %c0_i32_0 = arith.constant 0 : i32
    %c0_i32_1 = arith.constant 0 : i32
    return %c0_i32, %c0_i32_0 : i32, i32
  }
  func.func @transform_3(%arg0: i32) -> (i32, i32) {
    %c0_i32 = arith.constant 0 : i32
    %c0_i32_0 = arith.constant 0 : i32
    %c0_i32_1 = arith.constant 0 : i32
    return %c0_i32, %c0_i32_0 : i32, i32
  }
  func.func @transform_4(%arg0: i32) -> (i32, i32) {
    %c0_i32 = arith.constant 0 : i32
    %c0_i32_0 = arith.constant 0 : i32
    %c0_i32_1 = arith.constant 0 : i32
    return %c0_i32, %c0_i32_0 : i32, i32
  }
  func.func @transform_5(%arg0: i32) -> (i32, i32) {
    %c0_i32 = arith.constant 0 : i32
    %c0_i32_0 = arith.constant 0 : i32
    %c0_i32_1 = arith.constant 0 : i32
    return %c0_i32, %c0_i32_0 : i32, i32
  }
  func.func @transform_6(%arg0: i32) -> (i32, i32) {
    %c0_i32 = arith.constant 0 : i32
    %c0_i32_0 = arith.constant 0 : i32
    %c0_i32_1 = arith.constant 0 : i32
    return %c0_i32, %c0_i32_0 : i32, i32
  }
  func.func @transform_7(%arg0: i32) -> (i32, i32) {
    %c0_i32 = arith.constant 0 : i32
    %c0_i32_0 = arith.constant 0 : i32
    %c0_i32_1 = arith.constant 0 : i32
    return %c0_i32, %c0_i32_0 : i32, i32
  }
  func.func @transform_8(%arg0: i32) -> (i32, i32) {
    %c0_i32 = arith.constant 0 : i32
    %c0_i32_0 = arith.constant 0 : i32
    %c0_i32_1 = arith.constant 0 : i32
    return %c0_i32, %c0_i32_0 : i32, i32
  }
  func.func @transform_9(%arg0: i32) -> (i32, i32) {
    %c0_i32 = arith.constant 0 : i32
    %c0_i32_0 = arith.constant 0 : i32
    return %c0_i32, %arg0 : i32, i32
  }
}

</mosaic_0001>

<bundles_post_ra>
// kernel: tpu_custom_call.1
= control target key start
LH: loop header
LB: loop body
LE: loop exit
PB: predicated region body
PF: predicated region fallthrough
CT: control target
= control target key end

     0   :  { %v1194_v3 = vmov 0   ;;  %vm190_vm0 = vcmask 130048   ;;  %s1505_s0 = inlined_call_operand.vmem [shape: f32[16,128], index: 0, kind: input, shape index: {}]   ;;  %s1506_s1 = inlined_call_operand.vmem [shape: bf16[128,16], index: 1, kind: input, shape index: {}]   ;;  %s1507_s2 = inlined_call_operand.vmem [shape: f32[128,1], index: 2, kind: input, shape index: {}]   ;;  %s1508_s3 = inlined_call_operand.vmem [shape: bf16[128,128], index: 3, kind: input, shape index: {}]   ;;  %s1509_s4 = inlined_call_operand.vmem [shape: f32[128,1], index: 4, kind: input, shape index: {}]   ;;  %s1510_s5 = inlined_call_operand.vmem [shape: bf16[128,128], index: 5, kind: input, shape index: {}]   ;;  %s1511_s6 = inlined_call_operand.vmem [shape: f32[128,1], index: 6, kind: input, shape index: {}]   ;;  %s1512_s7 = inlined_call_operand.vmem [shape: bf16[8,128], index: 7, kind: input, shape index: {}]   ;;  %s1513_s8 = inlined_call_operand.<no memory space> [shape: f32[1,1], index: 8, kind: input, shape index: {}]   ;;  %s1514_s9 = inlined_call_operand.hbm [shape: f32[8,128], index: 9, kind: output, shape index: {}]  }
   0x1   :  { %v56_v0 = vld [vmem:[%s1507_s2 + $0x10] sm:$0xff]  ;;  %v54_v1 = vld [vmem:[%s1507_s2] sm:$0xff]  ;;  %1145 = vset.pattern.permute.xlu1 %v1194_v3  ;;  %1144 = vset.pattern.permute.xlu0 %v1194_v3  ;;  %v36_v4 = vld [vmem:[%s1505_s0 + $0x8] sm:$0xff] }
   0x2   :  { %v35_v2 = vld [vmem:[%s1505_s0] sm:$0xff]  ;;  %v57_v5 = vld [vmem:[%s1507_s2 + $0x18] sm:$0xff]  ;;  %82 = vperm.xlu1 %1145, %v56_v0   ;;  %72 = vperm.xlu0 %1144, %v54_v1   ;;  %v55_v8 = vld [vmem:[%s1507_s2 + $0x8] sm:$0xff] }
   0x3   :  { %v37_v6 = vpack.c.bf16 %v36_v4, %v35_v2  ;;  %v1146_v7 = vld [vmem:[%s1506_s1] sm:$0xff]   ;;  %v1147_v9 = vld [vmem:[%s1506_s1 + $0x8] sm:$0xff]   ;;  %v1148_v10 = vld [vmem:[%s1506_s1 + $0x10] sm:$0xff]  }
   0x4   :  { %1040 = vmatprep.mubr.msk.bf16.mxu0 %vm190_vm0, %v1146_v7  ;;  %v59_v11 = vld [vmem:[%s1507_s2 + $0x28] sm:$0xff]  ;;  %v58_v12 = vld [vmem:[%s1507_s2 + $0x20] sm:$0xff]  ;;  %v61_v13 = vld [vmem:[%s1507_s2 + $0x38] sm:$0xff] }
   0x5   :  { %1038 = vmatprep.subr.bf16.mxu0 %v37_v6  ;;  %v60_v14 = vld [vmem:[%s1507_s2 + $0x30] sm:$0xff]  ;;  %v1149_v15 = vld [vmem:[%s1506_s1 + $0x18] sm:$0xff]   ;;  %v1150_v16 = vld [vmem:[%s1506_s1 + $0x20] sm:$0xff]  }
   0x6   :  { %1039 = vmatpush3.bf16.msra.mxu0 %v37_v6  ;;  %87 = vperm.xlu1 %1145, %v57_v5   ;;  %v63_v17 = vld [vmem:[%s1507_s2 + $0x48] sm:$0xff]  ;;  %v62_v18 = vld [vmem:[%s1507_s2 + $0x40] sm:$0xff]  ;;  %v65_v19 = vld [vmem:[%s1507_s2 + $0x58] sm:$0xff] }
   0x7   :  { %77 = vperm.xlu0 %1144, %v55_v8   ;;  %v64_v20 = vld [vmem:[%s1507_s2 + $0x50] sm:$0xff]  ;;  %v1151_v21 = vld [vmem:[%s1506_s1 + $0x28] sm:$0xff]   ;;  %v66_v24 = vld [vmem:[%s1507_s2 + $0x60] sm:$0xff] }
   0x8   :  { %v1152_v22 = vld [vmem:[%s1506_s1 + $0x30] sm:$0xff]   ;;  %v67_v23 = vld [vmem:[%s1507_s2 + $0x68] sm:$0xff]  ;;  %v69_v25 = vld [vmem:[%s1507_s2 + $0x78] sm:$0xff] }
   0x9   :  { %1041 = vmatmul.mubr.msk.bf16.vlgmr.msra.gmra.mrb[0].mxu0 %vm190_vm0, %v1147_v9  ;;  %v68_v26 = vld [vmem:[%s1507_s2 + $0x70] sm:$0xff]  ;;  %v1153_v27 = vld [vmem:[%s1506_s1 + $0x38] sm:$0xff]   ;;  %v353_v28 = vld [vmem:[%s1509_s4 + $0x8] sm:$0xff] }
   0xa   :  { %1044 = vmatprep.mubr.msk.bf16.mxu0 %vm190_vm0, %v1148_v10  ;;  %97 = vperm.xlu1 %1145, %v59_v11   ;;  %v352_v29 = vld [vmem:[%s1509_s4] sm:$0xff]  ;;  %v355_v30 = vld [vmem:[%s1509_s4 + $0x18] sm:$0xff]  ;;  %v354_v31 = vld [vmem:[%s1509_s4 + $0x10] sm:$0xff] }
   0xb   :  { %92 = vperm.xlu0 %1144, %v58_v12  }
   0xe   :  { %107 = vperm.xlu1 %1145, %v61_v13  }
   0xf   :  { %102 = vperm.xlu0 %1144, %v60_v14  }
  0x11   :  { %1045 = vmatmul.mubr.msk.bf16.gmra.mrb[4].mxu0 %vm190_vm0, %v1149_v15 }
  0x12   :  { %1048 = vmatprep.mubr.msk.bf16.mxu0 %vm190_vm0, %v1150_v16  ;;  %117 = vperm.xlu1 %1145, %v63_v17  }
  0x13   :  { %112 = vperm.xlu0 %1144, %v62_v18  }
  0x16   :  { %127 = vperm.xlu1 %1145, %v65_v19  }
  0x17   :  { %122 = vperm.xlu0 %1144, %v64_v20  }
  0x19   :  { %1049 = vmatmul.mubr.msk.bf16.gmra.mrb[8].mxu0 %vm190_vm0, %v1151_v21 }
  0x1a   :  { %1052 = vmatprep.mubr.msk.bf16.mxu0 %vm190_vm0, %v1152_v22  ;;  %137 = vperm.xlu1 %1145, %v67_v23  }
  0x1b   :  { %132 = vperm.xlu0 %1144, %v66_v24  }
  0x1e   :  { %147 = vperm.xlu1 %1145, %v69_v25  }
  0x1f   :  { %142 = vperm.xlu0 %1144, %v68_v26  }
  0x21   :  { %1053 = vmatmul.mubr.msk.bf16.gmra.mrb[12].mxu0 %vm190_vm0, %v1153_v27 }
  0x22   :  { %375 = vperm.xlu1 %1145, %v353_v28  }
  0x23   :  { %370 = vperm.xlu0 %1144, %v352_v29  }
  0x24   :  { %15 = vsyncpa [#allocation4], 0  ;;  %v357_v32 = vld [vmem:[%s1509_s4 + $0x28] sm:$0xff]  ;;  %v356_v33 = vld [vmem:[%s1509_s4 + $0x20] sm:$0xff]  ;;  %vm1196_vm1 = vmmov 0   ;;  %s1197_s14 = smov [#allocation3]  }
  0x25   :  { %v359_v34 = vld [vmem:[%s1509_s4 + $0x38] sm:$0xff]  ;;  %v358_v35 = vld [vmem:[%s1509_s4 + $0x30] sm:$0xff]  ;;  %v361_v36 = vld [vmem:[%s1509_s4 + $0x48] sm:$0xff]  ;;  %s948_s15 = sshll.u32 %s1197_s14, 4  ;;  %s949_s15 = int_to_ptr.vmem [resolvable:$true] %s948_s15 }
  0x26   :  { %385 = vperm.xlu1 %1145, %v355_v30   ;;  %v360_v37 = vld [vmem:[%s1509_s4 + $0x40] sm:$0xff]  ;;  %v363_v38 = vld [vmem:[%s1509_s4 + $0x58] sm:$0xff]  ;;  %v362_v39 = vld [vmem:[%s1509_s4 + $0x50] sm:$0xff]  ;;  %s1170_s16 = scalar_lea.vmem %s949_s15, 128  ;;  %p1175_p1 = scmp.lt.s32.totalorder %s949_s15, %s949_s15 }
  0x27   :  { %380 = vperm.xlu0 %1144, %v354_v31   ;;  %v365_v40 = vld [vmem:[%s1509_s4 + $0x68] sm:$0xff]  ;;  %v364_v41 = vld [vmem:[%s1509_s4 + $0x60] sm:$0xff]  ;;  %v367_v42 = vld [vmem:[%s1509_s4 + $0x78] sm:$0xff]  ;;  %p1171_p0 = scmp.ne.s32.totalorder %s949_s15, %s1170_s16  ;;  %p1176_p2 = scmp.lt.s32.totalorder %s1170_s16, %s1170_s16 }
  0x28   :  { %v366_v43 = vld [vmem:[%s1509_s4 + $0x70] sm:$0xff]  ;;  %v634_v44 = vld [vmem:[%s1511_s6 + $0x8] sm:$0xff]  ;;  %v633_v45 = vld [vmem:[%s1511_s6] sm:$0xff] }
  0x29   :  { %v636_v46 = vld [vmem:[%s1511_s6 + $0x18] sm:$0xff]  ;;  %v635_v47 = vld [vmem:[%s1511_s6 + $0x10] sm:$0xff]  ;;  %v638_v48 = vld [vmem:[%s1511_s6 + $0x28] sm:$0xff]  ;;  %p1177_p3 = por %p1176_p2, %p1175_p1 }
  0x2a   :  { %395 = vperm.xlu1 %1145, %v357_v32   ;;  %v637_v49 = vld [vmem:[%s1511_s6 + $0x20] sm:$0xff]  ;;  %v640_v50 = vld [vmem:[%s1511_s6 + $0x38] sm:$0xff]  ;;  %v639_v51 = vld [vmem:[%s1511_s6 + $0x30] sm:$0xff] }
  0x2b   :  { %390 = vperm.xlu0 %1144, %v356_v33   ;;  %v642_v52 = vld [vmem:[%s1511_s6 + $0x48] sm:$0xff]  ;;  %v641_v53 = vld [vmem:[%s1511_s6 + $0x40] sm:$0xff]  ;;  %v644_v54 = vld [vmem:[%s1511_s6 + $0x58] sm:$0xff]  ;;  %p1178_p4 = pnand %p1177_p3, %p1171_p0 }
  0x2c   :  { %v643_v55 = vld [vmem:[%s1511_s6 + $0x50] sm:$0xff]  ;;  %v646_v56 = vld [vmem:[%s1511_s6 + $0x68] sm:$0xff]  ;;  %v645_v57 = vld [vmem:[%s1511_s6 + $0x60] sm:$0xff] }
  0x2d   :  { %v648_v58 = vld [vmem:[%s1511_s6 + $0x78] sm:$0xff]  ;;  %v647_v59 = vld [vmem:[%s1511_s6 + $0x70] sm:$0xff]  ;;  %v1154_v60 = vld [vmem:[%s1508_s3] sm:$0xff]  }
  0x2e   :  { %405 = vperm.xlu1 %1145, %v359_v34   ;;  %1072 = vmatprep.mubr.bf16.mxu1 %v1154_v60 }
  0x2f   :  { %400 = vperm.xlu0 %1144, %v358_v35  }
  0x32   :  { %415 = vperm.xlu1 %1145, %v361_v36  }
  0x33   :  { %410 = vperm.xlu0 %1144, %v360_v37  }
  0x36   :  { %425 = vperm.xlu1 %1145, %v363_v38  }
  0x37   :  { %420 = vperm.xlu0 %1144, %v362_v39  }
  0x3a   :  { %435 = vperm.xlu1 %1145, %v365_v40  }
  0x3b   :  { %430 = vperm.xlu0 %1144, %v364_v41  }
  0x3e   :  { %445 = vperm.xlu1 %1145, %v367_v42  }
  0x3f   :  { %440 = vperm.xlu0 %1144, %v366_v43  }
  0x42   :  { %656 = vperm.xlu1 %1145, %v634_v44  }
  0x43   :  { %651 = vperm.xlu0 %1144, %v633_v45  }
  0x46   :  { %666 = vperm.xlu1 %1145, %v636_v46  }
  0x47   :  { %661 = vperm.xlu0 %1144, %v635_v47  }
  0x4a   :  { %676 = vperm.xlu1 %1145, %v638_v48  }
  0x4b   :  { %671 = vperm.xlu0 %1144, %v637_v49  }
  0x4e   :  { %686 = vperm.xlu1 %1145, %v640_v50  }
  0x4f   :  { %681 = vperm.xlu0 %1144, %v639_v51  }
  0x52   :  { %696 = vperm.xlu1 %1145, %v642_v52  }
  0x53   :  { %691 = vperm.xlu0 %1144, %v641_v53  }
  0x56   :  { %706 = vperm.xlu1 %1145, %v644_v54  }
  0x57   :  { %701 = vperm.xlu0 %1144, %v643_v55  }
  0x5a   :  { %716 = vperm.xlu1 %1145, %v646_v56  }
  0x5b   :  { %711 = vperm.xlu0 %1144, %v645_v57  }
  0x5e   :  { %726 = vperm.xlu1 %1145, %v648_v58  }
  0x5f   :  { %721 = vperm.xlu0 %1144, %v647_v59  }
  0x81   :  { %v73_v61 = vpop.permute.xlu0 %72  ;;  %v83_v62 = vpop.permute.xlu1 %82 }
  0x85   :  { %v88_v0 = vpop.permute.xlu1 %87 }
  0x86   :  { %v78_v63 = vpop.permute.xlu0 %77 }
  0x89   :  { %v98_v2 = vpop.permute.xlu1 %97 }
  0x8a   :  { %v93_v1 = vpop.permute.xlu0 %92 }
  0x8d   :  { %v108_v7 = vpop.permute.xlu1 %107 }
  0x8e   :  { %v103_v3 = vpop.permute.xlu0 %102 }
  0x91   :  { %v118_v19 = vpop.permute.xlu1 %117 }
  0x92   :  { %v113_v15 = vpop.permute.xlu0 %112 }
  0x95   :  { %v128_v32 = vpop.permute.xlu1 %127 }
  0x96   :  { %v123_v28 = vpop.permute.xlu0 %122 }
  0x99   :  { %v138_v45 = vpop.permute.xlu1 %137 }
  0x9a   :  { %v133_v40 = vpop.permute.xlu0 %132 }
  0x9d   :  { %v148_v57 = vpop.permute.xlu1 %147 }
  0x9e   :  { %v143_v52 = vpop.permute.xlu0 %142 }
  0xdc   :  { %v1042_v4 = vpop.f32.mrb[0].mxu0 }
  0xdd   :  { %v258_v5 = vadd.f32 %v1042_v4, %v83_v62  ;;  %v249_v6 = vpop.f32.mrb[1].mxu0 }
  0xde   :  { %v250_v8 = vadd.f32 %v249_v6, %v73_v61  ;;  %v1043_v9 = vpop.f32.mrb[2].mxu0  ;;  %v1156_v6 = vld [vmem:[%s1508_s3 + $0x10] sm:$0xff]  }
  0xdf   :  { %v261_v10 = vadd.f32 %v1043_v9, %v88_v0  ;;  %v252_v11 = vpop.f32.mrb[3].mxu0  ;;  %v314_v13 = vmax.f32 %v258_v5, 0.0  ;;  %v1155_v5 = vld [vmem:[%s1508_s3 + $0x8] sm:$0xff]  }
  0xe0   :  { %v253_v12 = vadd.f32 %v252_v11, %v78_v63  ;;  %v312_v16 = vmax.f32 %v250_v8, 0.0  ;;  %v1158_v8 = vld [vmem:[%s1508_s3 + $0x20] sm:$0xff]   ;;  %v1159_v9 = vld [vmem:[%s1508_s3 + $0x28] sm:$0xff]   ;;  %v1161_v11 = vld [vmem:[%s1508_s3 + $0x38] sm:$0xff]  }
  0xe1   :  { %v315_v14 = vmax.f32 %v261_v10, 0.0  ;;  %v1160_v10 = vld [vmem:[%s1508_s3 + $0x30] sm:$0xff]  }
  0xe2   :  { %v313_v17 = vmax.f32 %v253_v12, 0.0  ;;  %v1162_v12 = vld [vmem:[%s1510_s5] sm:$0xff]  }
  0xe3   :  { %v345_v18 = vpack.c.bf16 %v315_v14, %v314_v13  ;;  %1104 = vmatprep.mubr.bf16.mxu0 %v1162_v12  ;;  %v371_v13 = vpop.permute.xlu0 %370  ;;  %v376_v14 = vpop.permute.xlu1 %375 }
  0xe4   :  { %v1046_v20 = vpop.f32.mrb[4].mxu0  ;;  %v344_v21 = vpack.c.bf16 %v313_v17, %v312_v16 }
  0xe5   :  { %v274_v22 = vadd.f32 %v1046_v20, %v103_v3  ;;  %v265_v23 = vpop.f32.mrb[5].mxu0 }
  0xe6   :  { %v266_v24 = vadd.f32 %v265_v23, %v93_v1  ;;  %v1047_v25 = vpop.f32.mrb[6].mxu0  ;;  %1056 = vmatprep.subr.bf16.mxu1 %v344_v21 }
  0xe7   :  { %v277_v26 = vadd.f32 %v1047_v25, %v108_v7  ;;  %v268_v27 = vpop.f32.mrb[7].mxu0  ;;  %1057 = vmatpush3.bf16.msra.mxu1 %v344_v21  ;;  %v318_v30 = vmax.f32 %v274_v22, 0.0  ;;  %v1157_v7 = vld [vmem:[%s1508_s3 + $0x18] sm:$0xff]   ;;  %v386_v16 = vpop.permute.xlu1 %385 }
  0xe8   :  { %v269_v29 = vadd.f32 %v268_v27, %v98_v2  ;;  %1058 = vmatprep.subr.bf16.mxu1 %v345_v18  ;;  %v316_v33 = vmax.f32 %v266_v24, 0.0 }
  0xe9   :  { %v319_v31 = vmax.f32 %v277_v26, 0.0 }
  0xea   :  { %v317_v34 = vmax.f32 %v269_v29, 0.0 }
  0xeb   :  { %v347_v35 = vpack.c.bf16 %v319_v31, %v318_v30  ;;  %1059 = vmatpush3.bf16.msra.mxu1 %v345_v18  ;;  %v396_v18 = vpop.permute.xlu1 %395 }
  0xec   :  { %v346_v36 = vpack.c.bf16 %v317_v34, %v316_v33  ;;  %v1050_v37 = vpop.f32.mrb[8].mxu0 }
  0xed   :  { %v290_v38 = vadd.f32 %v1050_v37, %v123_v28  ;;  %v281_v39 = vpop.f32.mrb[9].mxu0 }
  0xee   :  { %v282_v41 = vadd.f32 %v281_v39, %v113_v15  ;;  %v1051_v42 = vpop.f32.mrb[10].mxu0  ;;  %1060 = vmatprep.subr.bf16.mxu1 %v346_v36  ;;  %v381_v15 = vpop.permute.xlu0 %380 }
  0xef   :  { %v293_v43 = vadd.f32 %v1051_v42, %v128_v32  ;;  %v284_v44 = vpop.f32.mrb[11].mxu0  ;;  %1061 = vmatpush3.bf16.msra.mxu1 %v346_v36  ;;  %v322_v47 = vmax.f32 %v290_v38, 0.0  ;;  %v406_v23 = vpop.permute.xlu1 %405 }
  0xf0   :  { %v285_v46 = vadd.f32 %v284_v44, %v118_v19  ;;  %1062 = vmatprep.subr.bf16.mxu1 %v347_v35  ;;  %v320_v49 = vmax.f32 %v282_v41, 0.0 }
  0xf1   :  { %v323_v48 = vmax.f32 %v293_v43, 0.0 }
  0xf2   :  { %v321_v50 = vmax.f32 %v285_v46, 0.0  ;;  %v391_v17 = vpop.permute.xlu0 %390 }
  0xf3   :  { %v349_v51 = vpack.c.bf16 %v323_v48, %v322_v47  ;;  %1063 = vmatpush3.bf16.msra.mxu1 %v347_v35  ;;  %v416_v35 = vpop.permute.xlu1 %415 }
  0xf4   :  { %v348_v53 = vpack.c.bf16 %v321_v50, %v320_v49  ;;  %v1054_v54 = vpop.f32.mrb[12].mxu0 }
  0xf5   :  { %v306_v55 = vadd.f32 %v1054_v54, %v143_v52  ;;  %v297_v56 = vpop.f32.mrb[13].mxu0 }
  0xf6   :  { %v298_v58 = vadd.f32 %v297_v56, %v133_v40  ;;  %v1055_v59 = vpop.f32.mrb[14].mxu0  ;;  %1064 = vmatprep.subr.bf16.mxu1 %v348_v53  ;;  %v401_v19 = vpop.permute.xlu0 %400 }
  0xf7   :  { %v309_v60 = vadd.f32 %v1055_v59, %v148_v57  ;;  %v300_v61 = vpop.f32.mrb[15].mxu0  ;;  %1065 = vmatpush3.bf16.msra.mxu1 %v348_v53  ;;  %v326_v63 = vmax.f32 %v306_v55, 0.0  ;;  %v426_v48 = vpop.permute.xlu1 %425 }
  0xf8   :  { %v301_v62 = vadd.f32 %v300_v61, %v138_v45  ;;  %1066 = vmatprep.subr.bf16.mxu1 %v349_v51  ;;  %v324_v1 = vmax.f32 %v298_v58, 0.0 }
  0xf9   :  { %v327_v0 = vmax.f32 %v309_v60, 0.0 }
  0xfa   :  { %v325_v2 = vmax.f32 %v301_v62, 0.0  ;;  %v411_v31 = vpop.permute.xlu0 %410 }
  0xfb   :  { %v351_v3 = vpack.c.bf16 %v327_v0, %v326_v63  ;;  %1067 = vmatpush3.bf16.msra.mxu1 %v349_v51  ;;  %v436_v61 = vpop.permute.xlu1 %435 }
  0xfc   :  { %v350_v4 = vpack.c.bf16 %v325_v2, %v324_v1 }
  0xfe   :  { %1068 = vmatprep.subr.bf16.mxu1 %v350_v4  ;;  %v421_v44 = vpop.permute.xlu0 %420 }
  0xff   :  { %1069 = vmatpush3.bf16.msra.mxu1 %v350_v4 }
 0x100   :  { %1070 = vmatprep.subr.bf16.mxu1 %v351_v3 }
 0x102   :  { %v431_v56 = vpop.permute.xlu0 %430 }
 0x103   :  { %1071 = vmatpush3.bf16.msra.mxu1 %v351_v3 }
 0x106   :  { %1073 = vmatmul.mubr.bf16.vlgmr.msra.gmra.mrb[0].mxu1 %v1155_v5  ;;  %v441_v4 = vpop.permute.xlu0 %440 }
 0x107   :  { %1076 = vmatprep.mubr.bf16.mxu1 %v1156_v6 }
 0x10e   :  { %1077 = vmatmul.mubr.bf16.gmra.mrb[4].mxu1 %v1157_v7 }
 0x10f   :  { %1080 = vmatprep.mubr.bf16.mxu1 %v1158_v8 }
 0x116   :  { %1081 = vmatmul.mubr.bf16.gmra.mrb[8].mxu1 %v1159_v9  ;;  %v446_v9 = vpop.permute.xlu1 %445 }
 0x117   :  { %1084 = vmatprep.mubr.bf16.mxu1 %v1160_v10 }
 0x11e   :  { %1085 = vmatmul.mubr.bf16.gmra.mrb[12].mxu1 %v1161_v11 }
 0x1d9   :  { %v1074_v20 = vpop.f32.mrb[0].mxu1 }
 0x1da   :  { %v539_v21 = vadd.f32 %v1074_v20, %v381_v15  ;;  %v530_v22 = vpop.f32.mrb[1].mxu1 }
 0x1db   :  { %v531_v24 = vadd.f32 %v530_v22, %v371_v13  ;;  %v1075_v25 = vpop.f32.mrb[2].mxu1  ;;  %v1164_v22 = vld [vmem:[%s1510_s5 + $0x10] sm:$0xff]  }
 0x1dc   :  { %v542_v26 = vadd.f32 %v1075_v25, %v386_v16  ;;  %v533_v27 = vpop.f32.mrb[3].mxu1  ;;  %v595_v29 = vmax.f32 %v539_v21, 0.0  ;;  %v1163_v21 = vld [vmem:[%s1510_s5 + $0x8] sm:$0xff]  }
 0x1dd   :  { %v534_v28 = vadd.f32 %v533_v27, %v376_v14  ;;  %v593_v32 = vmax.f32 %v531_v24, 0.0  ;;  %v1166_v24 = vld [vmem:[%s1510_s5 + $0x20] sm:$0xff]   ;;  %v1167_v25 = vld [vmem:[%s1510_s5 + $0x28] sm:$0xff]   ;;  %v1169_v27 = vld [vmem:[%s1510_s5 + $0x38] sm:$0xff]  }
 0x1de   :  { %v596_v30 = vmax.f32 %v542_v26, 0.0  ;;  %v1168_v26 = vld [vmem:[%s1510_s5 + $0x30] sm:$0xff]  }
 0x1df   :  { %v594_v33 = vmax.f32 %v534_v28, 0.0  ;;  %v1195_v28 = vmov 0.0  }
 0x1e0   :  { %v626_v34 = vpack.c.bf16 %v596_v30, %v595_v29  ;;  %1120 = vmatprep.subr.bf16.mxu1 %v1195_v28  ;;  %1136 = vmatprep.mubr.msk.bf16.mxu1 %vm1196_vm1, %v1195_v28  ;;  %v652_v29 = vpop.permute.xlu0 %651  ;;  %v657_v30 = vpop.permute.xlu1 %656 }
 0x1e1   :  { %v625_v36 = vpack.c.bf16 %v594_v33, %v593_v32  ;;  %v1078_v37 = vpop.f32.mrb[4].mxu1 }
 0x1e2   :  { %v555_v38 = vadd.f32 %v1078_v37, %v401_v19  ;;  %v546_v39 = vpop.f32.mrb[5].mxu1 }
 0x1e3   :  { %v547_v40 = vadd.f32 %v546_v39, %v391_v17  ;;  %v1079_v41 = vpop.f32.mrb[6].mxu1  ;;  %1088 = vmatprep.subr.bf16.mxu0 %v625_v36 }
 0x1e4   :  { %v558_v42 = vadd.f32 %v1079_v41, %v406_v23  ;;  %v549_v43 = vpop.f32.mrb[7].mxu1  ;;  %1089 = vmatpush3.bf16.msra.mxu0 %v625_v36  ;;  %v599_v46 = vmax.f32 %v555_v38, 0.0  ;;  %v1165_v23 = vld [vmem:[%s1510_s5 + $0x18] sm:$0xff]   ;;  %v667_v32 = vpop.permute.xlu1 %666 }
 0x1e5   :  { %v550_v45 = vadd.f32 %v549_v43, %v396_v18  ;;  %1090 = vmatprep.subr.bf16.mxu0 %v626_v34  ;;  %v597_v49 = vmax.f32 %v547_v40, 0.0 }
 0x1e6   :  { %v600_v47 = vmax.f32 %v558_v42, 0.0 }
 0x1e7   :  { %v598_v50 = vmax.f32 %v550_v45, 0.0 }
 0x1e8   :  { %v628_v51 = vpack.c.bf16 %v600_v47, %v599_v46  ;;  %1091 = vmatpush3.bf16.msra.mxu0 %v626_v34  ;;  %v677_v34 = vpop.permute.xlu1 %676 }
 0x1e9   :  { %v627_v52 = vpack.c.bf16 %v598_v50, %v597_v49  ;;  %v1082_v53 = vpop.f32.mrb[8].mxu1 }
 0x1ea   :  { %v571_v54 = vadd.f32 %v1082_v53, %v421_v44  ;;  %v562_v55 = vpop.f32.mrb[9].mxu1 }
 0x1eb   :  { %v563_v57 = vadd.f32 %v562_v55, %v411_v31  ;;  %v1083_v58 = vpop.f32.mrb[10].mxu1  ;;  %1092 = vmatprep.subr.bf16.mxu0 %v627_v52  ;;  %v662_v31 = vpop.permute.xlu0 %661 }
 0x1ec   :  { %v574_v59 = vadd.f32 %v1083_v58, %v426_v48  ;;  %v565_v60 = vpop.f32.mrb[11].mxu1  ;;  %1093 = vmatpush3.bf16.msra.mxu0 %v627_v52  ;;  %v603_v63 = vmax.f32 %v571_v54, 0.0  ;;  %v687_v39 = vpop.permute.xlu1 %686 }
 0x1ed   :  { %v566_v62 = vadd.f32 %v565_v60, %v416_v35  ;;  %1094 = vmatprep.subr.bf16.mxu0 %v628_v51  ;;  %v601_v1 = vmax.f32 %v563_v57, 0.0 }
 0x1ee   :  { %v604_v0 = vmax.f32 %v574_v59, 0.0 }
 0x1ef   :  { %v602_v2 = vmax.f32 %v566_v62, 0.0  ;;  %v672_v33 = vpop.permute.xlu0 %671 }
 0x1f0   :  { %v630_v3 = vpack.c.bf16 %v604_v0, %v603_v63  ;;  %1095 = vmatpush3.bf16.msra.mxu0 %v628_v51  ;;  %v697_v51 = vpop.permute.xlu1 %696 }
 0x1f1   :  { %v629_v5 = vpack.c.bf16 %v602_v2, %v601_v1  ;;  %v1086_v6 = vpop.f32.mrb[12].mxu1 }
 0x1f2   :  { %v587_v7 = vadd.f32 %v1086_v6, %v441_v4  ;;  %v578_v8 = vpop.f32.mrb[13].mxu1 }
 0x1f3   :  { %v579_v10 = vadd.f32 %v578_v8, %v431_v56  ;;  %v1087_v11 = vpop.f32.mrb[14].mxu1  ;;  %1096 = vmatprep.subr.bf16.mxu0 %v629_v5  ;;  %v682_v35 = vpop.permute.xlu0 %681 }
 0x1f4   :  { %v590_v12 = vadd.f32 %v1087_v11, %v446_v9  ;;  %v581_v13 = vpop.f32.mrb[15].mxu1  ;;  %1097 = vmatpush3.bf16.msra.mxu0 %v629_v5  ;;  %v607_v15 = vmax.f32 %v587_v7, 0.0  ;;  %v707_v0 = vpop.permute.xlu1 %706 }
 0x1f5   :  { %v582_v14 = vadd.f32 %v581_v13, %v436_v61  ;;  %1098 = vmatprep.subr.bf16.mxu0 %v630_v3  ;;  %v605_v17 = vmax.f32 %v579_v10, 0.0 }
 0x1f6   :  { %v608_v16 = vmax.f32 %v590_v12, 0.0 }
 0x1f7   :  { %v606_v18 = vmax.f32 %v582_v14, 0.0  ;;  %v692_v47 = vpop.permute.xlu0 %691 }
 0x1f8   :  { %v632_v19 = vpack.c.bf16 %v608_v16, %v607_v15  ;;  %1099 = vmatpush3.bf16.msra.mxu0 %v630_v3  ;;  %v717_v13 = vpop.permute.xlu1 %716 }
 0x1f9   :  { %v631_v20 = vpack.c.bf16 %v606_v18, %v605_v17 }
 0x1fb   :  { %1100 = vmatprep.subr.bf16.mxu0 %v631_v20  ;;  %v702_v60 = vpop.permute.xlu0 %701 }
 0x1fc   :  { %1101 = vmatpush3.bf16.msra.mxu0 %v631_v20 }
 0x1fd   :  { %1102 = vmatprep.subr.bf16.mxu0 %v632_v19 }
 0x1ff   :  { %v712_v8 = vpop.permute.xlu0 %711 }
 0x200   :  { %1103 = vmatpush3.bf16.msra.mxu0 %v632_v19 }
 0x203   :  { %1105 = vmatmul.mubr.bf16.vlgmr.msra.gmra.mrb[16].mxu0 %v1163_v21  ;;  %v722_v20 = vpop.permute.xlu0 %721 }
 0x204   :  { %1108 = vmatprep.mubr.bf16.mxu0 %v1164_v22 }
 0x20b   :  { %1109 = vmatmul.mubr.bf16.gmra.mrb[20].mxu0 %v1165_v23 }
 0x20c   :  { %1112 = vmatprep.mubr.bf16.mxu0 %v1166_v24 }
 0x213   :  { %1113 = vmatmul.mubr.bf16.gmra.mrb[24].mxu0 %v1167_v25  ;;  %v727_v25 = vpop.permute.xlu1 %726 }
 0x214   :  { %1116 = vmatprep.mubr.bf16.mxu0 %v1168_v26 }
 0x21b   :  { %1117 = vmatmul.mubr.bf16.gmra.mrb[28].mxu0 %v1169_v27 }
 0x2d6   :  { %v1106_v36 = vpop.f32.mrb[16].mxu0 }
 0x2d7   :  { %v820_v37 = vadd.f32 %v1106_v36, %v662_v31  ;;  %v811_v38 = vpop.f32.mrb[17].mxu0 }
 0x2d8   :  { %v812_v40 = vadd.f32 %v811_v38, %v652_v29  ;;  %v1107_v41 = vpop.f32.mrb[18].mxu0  ;;  %v890_v38 = vld [vmem:[%s1512_s7] sm:$0xf] }
 0x2d9   :  { %v823_v42 = vadd.f32 %v1107_v41, %v667_v32  ;;  %v814_v43 = vpop.f32.mrb[19].mxu0  ;;  %v876_v45 = vmax.f32 %v820_v37, 0.0 }
 0x2da   :  { %v815_v44 = vadd.f32 %v814_v43, %v657_v30  ;;  %v874_v48 = vmax.f32 %v812_v40, 0.0 }
 0x2db   :  { %v877_v46 = vmax.f32 %v823_v42, 0.0 }
 0x2dc   :  { %v875_v49 = vmax.f32 %v815_v44, 0.0 }
 0x2dd   :  { %v892_v50 = vpack.c.bf16 %v877_v46, %v876_v45 }
 0x2de   :  { %v891_v52 = vpack.c.bf16 %v875_v49, %v874_v48  ;;  %v1110_v53 = vpop.f32.mrb[20].mxu0 }
 0x2df   :  { %v836_v54 = vadd.f32 %v1110_v53, %v682_v35  ;;  %v827_v55 = vpop.f32.mrb[21].mxu0 }
 0x2e0   :  { %v828_v56 = vadd.f32 %v827_v55, %v672_v33  ;;  %v1111_v57 = vpop.f32.mrb[22].mxu0  ;;  %1121 = vmatpush3.bf16.msra.mxu1 %v891_v52 }
 0x2e1   :  { %v839_v58 = vadd.f32 %v1111_v57, %v687_v39  ;;  %v830_v59 = vpop.f32.mrb[23].mxu0  ;;  %1122 = vmatprep.subr.bf16.mxu1 %v1195_v28  ;;  %v880_v62 = vmax.f32 %v836_v54, 0.0  ;;  %v900_v39 = vstv %s1513_s8 }
 0x2e2   :  { %v831_v61 = vadd.f32 %v830_v59, %v677_v34  ;;  %v878_v1 = vmax.f32 %v828_v56, 0.0 }
 0x2e3   :  { %v881_v63 = vmax.f32 %v839_v58, 0.0 }
 0x2e4   :  { %v879_v2 = vmax.f32 %v831_v61, 0.0  ;;  %1123 = vmatpush3.bf16.msra.mxu1 %v892_v50 }
 0x2e5   :  { %v894_v3 = vpack.c.bf16 %v881_v63, %v880_v62  ;;  %1124 = vmatprep.subr.bf16.mxu1 %v1195_v28 }
 0x2e6   :  { %v893_v4 = vpack.c.bf16 %v879_v2, %v878_v1  ;;  %v1114_v5 = vpop.f32.mrb[24].mxu0 }
 0x2e7   :  { %v852_v6 = vadd.f32 %v1114_v5, %v702_v60  ;;  %v843_v7 = vpop.f32.mrb[25].mxu0 }
 0x2e8   :  { %v844_v9 = vadd.f32 %v843_v7, %v692_v47  ;;  %v1115_v10 = vpop.f32.mrb[26].mxu0  ;;  %1125 = vmatpush3.bf16.msra.mxu1 %v893_v4 }
 0x2e9   :  { %v855_v11 = vadd.f32 %v1115_v10, %v707_v0  ;;  %v846_v12 = vpop.f32.mrb[27].mxu0  ;;  %1126 = vmatprep.subr.bf16.mxu1 %v1195_v28  ;;  %v884_v15 = vmax.f32 %v852_v6, 0.0 }
 0x2ea   :  { %v847_v14 = vadd.f32 %v846_v12, %v697_v51  ;;  %v882_v17 = vmax.f32 %v844_v9, 0.0 }
 0x2eb   :  { %v885_v16 = vmax.f32 %v855_v11, 0.0 }
 0x2ec   :  { %v883_v18 = vmax.f32 %v847_v14, 0.0  ;;  %1127 = vmatpush3.bf16.msra.mxu1 %v894_v3 }
 0x2ed   :  { %v896_v19 = vpack.c.bf16 %v885_v16, %v884_v15  ;;  %1128 = vmatprep.subr.bf16.mxu1 %v1195_v28 }
 0x2ee   :  { %v895_v21 = vpack.c.bf16 %v883_v18, %v882_v17  ;;  %v1118_v22 = vpop.f32.mrb[28].mxu0 }
 0x2ef   :  { %v868_v23 = vadd.f32 %v1118_v22, %v722_v20  ;;  %v859_v24 = vpop.f32.mrb[29].mxu0 }
 0x2f0   :  { %v860_v26 = vadd.f32 %v859_v24, %v712_v8  ;;  %v1119_v27 = vpop.f32.mrb[30].mxu0  ;;  %1129 = vmatpush3.bf16.msra.mxu1 %v895_v21 }
 0x2f1   :  { %v871_v29 = vadd.f32 %v1119_v27, %v727_v25  ;;  %v862_v30 = vpop.f32.mrb[31].mxu0  ;;  %1130 = vmatprep.subr.bf16.mxu1 %v1195_v28  ;;  %v888_v32 = vmax.f32 %v868_v23, 0.0 }
 0x2f2   :  { %v863_v31 = vadd.f32 %v862_v30, %v717_v13  ;;  %v886_v34 = vmax.f32 %v860_v26, 0.0 }
 0x2f3   :  { %v889_v33 = vmax.f32 %v871_v29, 0.0 }
 0x2f4   :  { %v887_v35 = vmax.f32 %v863_v31, 0.0  ;;  %1131 = vmatpush3.bf16.msra.mxu1 %v896_v19 }
 0x2f5   :  { %v898_v36 = vpack.c.bf16 %v889_v33, %v888_v32  ;;  %1132 = vmatprep.subr.bf16.mxu1 %v1195_v28 }
 0x2f6   :  { %v897_v37 = vpack.c.bf16 %v887_v35, %v886_v34 }
 0x2f8   :  { %1133 = vmatpush3.bf16.msra.mxu1 %v897_v37 }
 0x2f9   :  { %1134 = vmatprep.subr.bf16.mxu1 %v1195_v28 }
 0x2fc   :  { %1135 = vmatpush3.bf16.msra.mxu1 %v898_v36 }
 0x2ff   :  { %1137 = vmatmul.mubr.bf16.vlgmr.msra.gmra.mrb[16].mxu1 %v890_v38 }
 0x3d2   :  { %v935_v40 = vpop.f32.mrb[16].mxu1 }
 0x3d3   :  { %v936_v41 = vadd.f32 %v935_v40, %v900_v39  ;;  %v1138_v42 = vpop.f32.mrb[17].mxu1 }
 0x3d4   :  { %v938_v43 = vpop.f32.mrb[18].mxu1 }
 0x3d5   :  { %941 = vst [vmem:[#allocation3] sm:$0xff] %v936_v41  ;;  %v1139_v44 = vpop.f32.mrb[19].mxu1 }
 0x3d6   :  { %1181 = shalt.err (!%p1178_p4)
}
 0x3d7   :  { %s1182_s8 = scalar_lea.hbm %s1514_s9, 128 }
 0x3d8   :  { %p1183_p5 = scmp.ne.s32.totalorder %s1514_s9, %s1182_s8  ;;  %p1186_p6 = scmp.lt.u32.totalorder %s1182_s8, %s1514_s9 }
 0x3da   :  { %p1188_p7 = pnand %p1186_p6, %p1183_p5 }
 0x3dc   :  { %1191 = shalt.err (!%p1188_p7)
}
 0x3dd   :  { %951 = dma.vmem_to_hbm [thread:$0]  %s949_s15, 128, %s1514_s9, [#allocation4]  }
 0x3de   :  { %1192 = dma.done.wait [#allocation4], 128  }
 0x3df   :  { %1193 = vsyncadd [#allocation4], 4294967168 }
 0x3e0   :  { %955 = vsyncpa [#allocation4], 1 }

</bundles_post_ra>
